<compile_context>
chip_gen: v5e
topology: v5e:2x2
jax: 0.10.0
libtpu: 0.0.40
codegen_flags: <defaults>
</compile_context>

<pallas_src>
from typing import NamedTuple

import jax
import jax.numpy as jnp
from jax.experimental import pallas as pl
from jax.experimental.pallas import tpu as pltpu


class AttnParams(NamedTuple):
    w_hid_t: jax.Array   # (D, H)   hidden part of W1, pre-transposed
    w_ann_t: jax.Array   # (2E, H)  annotation part of W1, pre-transposed
    b1_row: jax.Array    # (1, H)   linear_combined bias (f32)
    w2_row: jax.Array    # (1, H)   linear_attn weight row (f32)


def prepare_attention_params(w1, b1, w2, dc_hidden_size, *,
                             compute_dtype=jnp.float32) -> AttnParams:
    """Parameter-only prep, hoisted out of the per-decode-step path."""
    D = dc_hidden_size
    w1 = jnp.asarray(w1, jnp.float32)
    w_hid_t = w1[:, :D].T.astype(compute_dtype)              # (D, H)
    w_ann_t = w1[:, D:].T.astype(compute_dtype)              # (2E, H)
    b1_row = jnp.asarray(b1, jnp.float32).reshape(1, -1)     # (1, H)
    w2_row = jnp.asarray(w2, jnp.float32).reshape(1, -1)     # (1, H)
    return AttnParams(w_hid_t, w_ann_t, b1_row, w2_row)


def _attention_kernel(ann_ref, w_ann_ref, hid_ref, w_hid_ref, b1_ref, w2_ref,
                      out_ref):
    # ann_ref  : (B*S, 2E)  annotations, batch-major flattened rows
    # w_ann_ref: (2E, H)    annotation part of W1^T
    # hid_ref  : (B, D)     decoder hidden state
    # w_hid_ref: (D, H)     hidden part of W1^T
    # b1_ref   : (1, H)     bias (f32)
    # w2_ref   : (1, H)     score weights (f32)
    # out_ref  : (S, 128)   lane-padded softmax over batch (valid lanes 0..B-1)
    S, n_lanes = out_ref.shape
    B = hid_ref.shape[0]

    # S-invariant hidden contribution folded into an effective bias:
    # (B, D) @ (D, H) + b1 -> (B, H).  f32 accumulation on the MXU.
    hid_proj = jnp.dot(hid_ref[...], w_hid_ref[...],
                       preferred_element_type=jnp.float32) + b1_ref[...]

    # One flat MXU matmul for all (s, b): (B*S, 2E) @ (2E, H) -> (B*S, H).
    proj = jnp.dot(ann_ref[...], w_ann_ref[...],
                   preferred_element_type=jnp.float32)

    lane_ids = jax.lax.broadcasted_iota(jnp.int32, (S, n_lanes), 1)
    acc = jnp.zeros((S, n_lanes), jnp.float32)
    for b in range(B):  # static, tiny; chunks are 8-sublane aligned
        combined_b = jnp.tanh(proj[b * S:(b + 1) * S, :] + hid_proj[b:b + 1, :])
        # score[s] = sum_h combined[s, h] * w2[h]  — one full-lane reduce.
        col_b = jnp.sum(combined_b * w2_ref[...], axis=-1, keepdims=True)
        # Scatter into lane b of the output slab (VPU mask-multiply, no concat).
        acc = acc + col_b * (lane_ids == b).astype(jnp.float32)

    # Softmax over dim=1 (the batch dimension), matching the PyTorch module.
    scores = jnp.where(lane_ids < B, acc, jnp.float32(-1e30))
    m = jnp.max(scores, axis=-1, keepdims=True)
    e = jnp.exp(scores - m)
    denom = jnp.sum(e, axis=-1, keepdims=True)
    out_ref[...] = e * pl.reciprocal(denom, approx=False)


def attention_forward(annotations, hidden, params: AttnParams):
    """annotations: (S, B, 2E) or (S, 2E); hidden: (1, B, D) or (1, D).
    Returns softmax attention weights, (S, B) or (S,), f32."""
    is_batched = annotations.ndim == 3
    if not is_batched:
        annotations = annotations[:, None, :]
        hidden = hidden[:, None, :]

    S, B, E2 = annotations.shape
    D = hidden.shape[-1]
    compute_dtype = params.w_ann_t.dtype
    n_lanes = 128 * ((B + 127) // 128)

    # Batch-major flatten so every per-b chunk is an aligned 8-sublane block.
    ann_bm = jnp.transpose(annotations, (1, 0, 2)).reshape(B * S, E2)
    ann_bm = ann_bm.astype(compute_dtype)
    hid = hidden.reshape(B, D).astype(compute_dtype)

    vmem = pl.BlockSpec(memory_space=pltpu.MemorySpace.VMEM)
    out_padded = pl.pallas_call(
        _attention_kernel,
        out_shape=jax.ShapeDtypeStruct((S, n_lanes), jnp.float32),
        in_specs=[vmem] * 6,
        out_specs=vmem,
    )(ann_bm, params.w_ann_t, hid, params.w_hid_t, params.b1_row, params.w2_row)

    attn = out_padded[:, :B]
    if not is_batched:
        attn = attn[:, 0]
    return attn


def _reference(annotations, hidden, w1, b1, w2):
    # Plain-JAX mirror of the PyTorch forward (batched), for a sanity check.
    S = annotations.shape[0]
    hid_rep = jnp.repeat(hidden, S, axis=0)                 # (S, B, D)
    combined = jnp.concatenate([hid_rep, annotations], axis=2)
    combined = jnp.tanh(combined @ w1.T + b1)
    attn = (combined @ w2.T)[..., 0]                        # (S, B)
    return jax.nn.softmax(attn, axis=1)


if __name__ == "__main__":
    # Small, module-consistent shapes.
    ec_hidden = 16          # annotations feature = 2*ec_hidden = 32
    dc_hidden = 32          # hidden feature = attn_hidden = 32
    src_len = 8
    batch = 4

    key = jax.random.PRNGKey(0)
    k_ann, k_hid, k_w1, k_b1, k_w2 = jax.random.split(key, 5)

    annotations = jax.random.normal(
        k_ann, (src_len, batch, 2 * ec_hidden), dtype=jnp.float32)
    hidden = jax.random.normal(k_hid, (1, batch, dc_hidden), dtype=jnp.float32)

    # Deterministic synthetic parameters (nn.Linear shapes).
    in_comb = dc_hidden + 2 * ec_hidden
    bound1 = 1.0 / (in_comb ** 0.5)
    w1 = jax.random.uniform(k_w1, (dc_hidden, in_comb),
                            minval=-bound1, maxval=bound1, dtype=jnp.float32)
    b1 = jax.random.uniform(k_b1, (dc_hidden,),
                            minval=-bound1, maxval=bound1, dtype=jnp.float32)
    bound2 = 1.0 / (dc_hidden ** 0.5)
    w2 = jax.random.uniform(k_w2, (1, dc_hidden),
                            minval=-bound2, maxval=bound2, dtype=jnp.float32)

    ref = _reference(annotations, hidden, w1, b1, w2)

    # Parameter prep done ONCE (hoisted out of the per-step path).
    params = prepare_attention_params(w1, b1, w2, dc_hidden)

    # Batched path (f32 MXU operands, exact).
    out = jax.block_until_ready(attention_forward(annotations, hidden, params))
    assert out.shape == (src_len, batch)
    assert jnp.allclose(out, ref, atol=1e-5, rtol=1e-5)

    # Unbatched path (module supports 2-D inputs).
    out2 = jax.block_until_ready(
        attention_forward(annotations[:, 0, :], hidden[:, 0, :], params))
    ref2 = _reference(annotations[:, :1, :], hidden[:, :1, :], w1, b1, w2)[:, 0]
    assert out2.shape == (src_len,)
    assert jnp.allclose(out2, ref2, atol=1e-5, rtol=1e-5)

    # bf16 MXU operands (v5e feedback); tanh/softmax remain f32.
    params_bf16 = prepare_attention_params(w1, b1, w2, dc_hidden,
                                           compute_dtype=jnp.bfloat16)
    out_bf16 = jax.block_until_ready(
        attention_forward(annotations, hidden, params_bf16))
    assert out_bf16.shape == (src_len, batch)
    assert jnp.allclose(out_bf16, ref, atol=1e-2, rtol=1e-2)

    print("KERNEL_OK")
</pallas_src>

<mosaic_0001>
module attributes {stable_mosaic.version = 11 : i64} {
  func.func @_attention_kernel(%arg0: memref<32x32xf32, #tpu.memory_space<vmem>>, %arg1: memref<32x32xf32, #tpu.memory_space<vmem>>, %arg2: memref<4x32xf32, #tpu.memory_space<vmem>>, %arg3: memref<32x32xf32, #tpu.memory_space<vmem>>, %arg4: memref<1x32xf32, #tpu.memory_space<vmem>>, %arg5: memref<1x32xf32, #tpu.memory_space<vmem>>, %arg6: memref<8x128xf32, #tpu.memory_space<vmem>>) attributes {dimension_semantics = [], scalar_prefetch = 0 : i64, scratch_operands = 0 : i64, tpu.core_type = #tpu.core_type<tc>} {
    %c0 = arith.constant 0 : index
    %c0_0 = arith.constant 0 : index
    %0 = vector.load %arg2[%c0, %c0_0] : memref<4x32xf32, #tpu.memory_space<vmem>>, vector<4x32xf32>
    %c0_1 = arith.constant 0 : index
    %c0_2 = arith.constant 0 : index
    %1 = vector.load %arg3[%c0_1, %c0_2] : memref<32x32xf32, #tpu.memory_space<vmem>>, vector<32x32xf32>
    %cst = arith.constant dense<0.000000e+00> : vector<4x32xf32>
    %2 = tpu.matmul %0, %1, %cst {dimension_numbers = #tpu.dot_dimension_numbers<[1], [0], [0], [1], [0, 0, 1, 1], [], []>} : vector<4x32xf32>, vector<32x32xf32>, vector<4x32xf32> -> vector<4x32xf32>
    %c0_3 = arith.constant 0 : index
    %c0_4 = arith.constant 0 : index
    %3 = vector.load %arg4[%c0_3, %c0_4] : memref<1x32xf32, #tpu.memory_space<vmem>>, vector<1x32xf32>
    %4 = vector.broadcast %3 : vector<1x32xf32> to vector<4x32xf32>
    %5 = arith.addf %2, %4 : vector<4x32xf32>
    %c0_5 = arith.constant 0 : index
    %c0_6 = arith.constant 0 : index
    %6 = vector.load %arg0[%c0_5, %c0_6] : memref<32x32xf32, #tpu.memory_space<vmem>>, vector<32x32xf32>
    %c0_7 = arith.constant 0 : index
    %c0_8 = arith.constant 0 : index
    %7 = vector.load %arg1[%c0_7, %c0_8] : memref<32x32xf32, #tpu.memory_space<vmem>>, vector<32x32xf32>
    %cst_9 = arith.constant dense<0.000000e+00> : vector<32x32xf32>
    %8 = tpu.matmul %6, %7, %cst_9 {dimension_numbers = #tpu.dot_dimension_numbers<[1], [0], [0], [1], [0, 0, 1, 1], [], []>} : vector<32x32xf32>, vector<32x32xf32>, vector<32x32xf32> -> vector<32x32xf32>
    %9 = tpu.iota {dimensions = array<i32: 1>} : vector<8x128xi32>
    %cst_10 = arith.constant 0.000000e+00 : f32
    %10 = vector.broadcast %cst_10 : f32 to vector<8x128xf32>
    %11 = vector.extract_strided_slice %8 {offsets = [0, 0], sizes = [8, 32], strides = [1, 1]} : vector<32x32xf32> to vector<8x32xf32>
    %12 = vector.extract_strided_slice %5 {offsets = [0, 0], sizes = [1, 32], strides = [1, 1]} : vector<4x32xf32> to vector<1x32xf32>
    %13 = vector.broadcast %12 : vector<1x32xf32> to vector<8x32xf32>
    %14 = arith.addf %11, %13 : vector<8x32xf32>
    %15 = math.tanh %14 : vector<8x32xf32>
    %c0_11 = arith.constant 0 : index
    %c0_12 = arith.constant 0 : index
    %16 = vector.load %arg5[%c0_11, %c0_12] : memref<1x32xf32, #tpu.memory_space<vmem>>, vector<1x32xf32>
    %17 = vector.broadcast %16 : vector<1x32xf32> to vector<8x32xf32>
    %18 = arith.mulf %15, %17 : vector<8x32xf32>
    %cst_13 = arith.constant dense<0.000000e+00> : vector<8xf32>
    %19 = vector.multi_reduction <add>, %18, %cst_13 [1] : vector<8x32xf32> to vector<8xf32>
    %20 = vector.shape_cast %19 : vector<8xf32> to vector<8x1xf32>
    %c0_i32 = arith.constant 0 : i32
    %21 = vector.broadcast %c0_i32 : i32 to vector<8x128xi32>
    %22 = arith.cmpi eq, %9, %21 : vector<8x128xi32>
    %23 = arith.extui %22 : vector<8x128xi1> to vector<8x128xi32>
    %24 = arith.sitofp %23 : vector<8x128xi32> to vector<8x128xf32>
    %25 = vector.broadcast %20 : vector<8x1xf32> to vector<8x128xf32>
    %26 = arith.mulf %25, %24 : vector<8x128xf32>
    %27 = arith.addf %10, %26 : vector<8x128xf32>
    %28 = vector.extract_strided_slice %8 {offsets = [8, 0], sizes = [8, 32], strides = [1, 1]} : vector<32x32xf32> to vector<8x32xf32>
    %29 = vector.extract_strided_slice %5 {offsets = [1, 0], sizes = [1, 32], strides = [1, 1]} : vector<4x32xf32> to vector<1x32xf32>
    %30 = vector.broadcast %29 : vector<1x32xf32> to vector<8x32xf32>
    %31 = arith.addf %28, %30 : vector<8x32xf32>
    %32 = math.tanh %31 : vector<8x32xf32>
    %c0_14 = arith.constant 0 : index
    %c0_15 = arith.constant 0 : index
    %33 = vector.load %arg5[%c0_14, %c0_15] : memref<1x32xf32, #tpu.memory_space<vmem>>, vector<1x32xf32>
    %34 = vector.broadcast %33 : vector<1x32xf32> to vector<8x32xf32>
    %35 = arith.mulf %32, %34 : vector<8x32xf32>
    %cst_16 = arith.constant dense<0.000000e+00> : vector<8xf32>
    %36 = vector.multi_reduction <add>, %35, %cst_16 [1] : vector<8x32xf32> to vector<8xf32>
    %37 = vector.shape_cast %36 : vector<8xf32> to vector<8x1xf32>
    %c1_i32 = arith.constant 1 : i32
    %38 = vector.broadcast %c1_i32 : i32 to vector<8x128xi32>
    %39 = arith.cmpi eq, %9, %38 : vector<8x128xi32>
    %40 = arith.extui %39 : vector<8x128xi1> to vector<8x128xi32>
    %41 = arith.sitofp %40 : vector<8x128xi32> to vector<8x128xf32>
    %42 = vector.broadcast %37 : vector<8x1xf32> to vector<8x128xf32>
    %43 = arith.mulf %42, %41 : vector<8x128xf32>
    %44 = arith.addf %27, %43 : vector<8x128xf32>
    %45 = vector.extract_strided_slice %8 {offsets = [16, 0], sizes = [8, 32], strides = [1, 1]} : vector<32x32xf32> to vector<8x32xf32>
    %46 = vector.extract_strided_slice %5 {offsets = [2, 0], sizes = [1, 32], strides = [1, 1]} : vector<4x32xf32> to vector<1x32xf32>
    %47 = vector.broadcast %46 : vector<1x32xf32> to vector<8x32xf32>
    %48 = arith.addf %45, %47 : vector<8x32xf32>
    %49 = math.tanh %48 : vector<8x32xf32>
    %c0_17 = arith.constant 0 : index
    %c0_18 = arith.constant 0 : index
    %50 = vector.load %arg5[%c0_17, %c0_18] : memref<1x32xf32, #tpu.memory_space<vmem>>, vector<1x32xf32>
    %51 = vector.broadcast %50 : vector<1x32xf32> to vector<8x32xf32>
    %52 = arith.mulf %49, %51 : vector<8x32xf32>
    %cst_19 = arith.constant dense<0.000000e+00> : vector<8xf32>
    %53 = vector.multi_reduction <add>, %52, %cst_19 [1] : vector<8x32xf32> to vector<8xf32>
    %54 = vector.shape_cast %53 : vector<8xf32> to vector<8x1xf32>
    %c2_i32 = arith.constant 2 : i32
    %55 = vector.broadcast %c2_i32 : i32 to vector<8x128xi32>
    %56 = arith.cmpi eq, %9, %55 : vector<8x128xi32>
    %57 = arith.extui %56 : vector<8x128xi1> to vector<8x128xi32>
    %58 = arith.sitofp %57 : vector<8x128xi32> to vector<8x128xf32>
    %59 = vector.broadcast %54 : vector<8x1xf32> to vector<8x128xf32>
    %60 = arith.mulf %59, %58 : vector<8x128xf32>
    %61 = arith.addf %44, %60 : vector<8x128xf32>
    %62 = vector.extract_strided_slice %8 {offsets = [24, 0], sizes = [8, 32], strides = [1, 1]} : vector<32x32xf32> to vector<8x32xf32>
    %63 = vector.extract_strided_slice %5 {offsets = [3, 0], sizes = [1, 32], strides = [1, 1]} : vector<4x32xf32> to vector<1x32xf32>
    %64 = vector.broadcast %63 : vector<1x32xf32> to vector<8x32xf32>
    %65 = arith.addf %62, %64 : vector<8x32xf32>
    %66 = math.tanh %65 : vector<8x32xf32>
    %c0_20 = arith.constant 0 : index
    %c0_21 = arith.constant 0 : index
    %67 = vector.load %arg5[%c0_20, %c0_21] : memref<1x32xf32, #tpu.memory_space<vmem>>, vector<1x32xf32>
    %68 = vector.broadcast %67 : vector<1x32xf32> to vector<8x32xf32>
    %69 = arith.mulf %66, %68 : vector<8x32xf32>
    %cst_22 = arith.constant dense<0.000000e+00> : vector<8xf32>
    %70 = vector.multi_reduction <add>, %69, %cst_22 [1] : vector<8x32xf32> to vector<8xf32>
    %71 = vector.shape_cast %70 : vector<8xf32> to vector<8x1xf32>
    %c3_i32 = arith.constant 3 : i32
    %72 = vector.broadcast %c3_i32 : i32 to vector<8x128xi32>
    %73 = arith.cmpi eq, %9, %72 : vector<8x128xi32>
    %74 = arith.extui %73 : vector<8x128xi1> to vector<8x128xi32>
    %75 = arith.sitofp %74 : vector<8x128xi32> to vector<8x128xf32>
    %76 = vector.broadcast %71 : vector<8x1xf32> to vector<8x128xf32>
    %77 = arith.mulf %76, %75 : vector<8x128xf32>
    %78 = arith.addf %61, %77 : vector<8x128xf32>
    %c4_i32 = arith.constant 4 : i32
    %79 = vector.broadcast %c4_i32 : i32 to vector<8x128xi32>
    %80 = arith.cmpi slt, %9, %79 : vector<8x128xi32>
    %cst_23 = arith.constant -1.000000e+30 : f32
    %81 = vector.broadcast %cst_23 : f32 to vector<8x128xf32>
    %82 = arith.select %80, %78, %81 : vector<8x128xi1>, vector<8x128xf32>
    %cst_24 = arith.constant dense<0xFF800000> : vector<8xf32>
    %83 = vector.multi_reduction <maximumf>, %82, %cst_24 [1] : vector<8x128xf32> to vector<8xf32>
    %84 = vector.shape_cast %83 : vector<8xf32> to vector<8x1xf32>
    %85 = vector.broadcast %84 : vector<8x1xf32> to vector<8x128xf32>
    %86 = arith.subf %82, %85 : vector<8x128xf32>
    %87 = math.exp %86 : vector<8x128xf32>
    %cst_25 = arith.constant dense<0.000000e+00> : vector<8xf32>
    %88 = vector.multi_reduction <add>, %87, %cst_25 [1] : vector<8x128xf32> to vector<8xf32>
    %89 = vector.shape_cast %88 : vector<8xf32> to vector<8x1xf32>
    %90 = tpu.reciprocal %89 : vector<8x1xf32> -> vector<8x1xf32>
    %91 = vector.broadcast %90 : vector<8x1xf32> to vector<8x128xf32>
    %92 = arith.mulf %87, %91 : vector<8x128xf32>
    %c0_26 = arith.constant 0 : index
    %c0_27 = arith.constant 0 : index
    %93 = vector.load %arg6[%c0_26, %c0_27] : memref<8x128xf32, #tpu.memory_space<vmem>>, vector<8x128xf32>
    tpu.vector_store %arg6[%c0_26, %c0_27], %92 {strides = array<i32>} : memref<8x128xf32, #tpu.memory_space<vmem>>, vector<8x128xf32>,
    return
  }
}

</mosaic_0001>

<bundles_post_ra>
// kernel: tpu_custom_call.1
= control target key start
LH: loop header
LB: loop body
LE: loop exit
PB: predicated region body
PF: predicated region fallthrough
CT: control target
= control target key end

     0   :  { %11 = vsyncpa [#allocation3], 0  ;;  %s505_s0 = inlined_call_operand.hbm [shape: f32[32,32], index: 0, kind: input, shape index: {}]   ;;  %s506_s1 = inlined_call_operand.hbm [shape: f32[32,32], index: 1, kind: input, shape index: {}]   ;;  %s507_s2 = inlined_call_operand.hbm [shape: f32[4,32], index: 2, kind: input, shape index: {}]   ;;  %s508_s3 = inlined_call_operand.hbm [shape: f32[32,32], index: 3, kind: input, shape index: {}]   ;;  %s509_s4 = inlined_call_operand.vmem [shape: f32[1,32], index: 4, kind: input, shape index: {}]   ;;  %s510_s5 = inlined_call_operand.vmem [shape: f32[1,32], index: 5, kind: input, shape index: {}]   ;;  %s511_s6 = inlined_call_operand.hbm [shape: f32[8,128], index: 6, kind: output, shape index: {}]  }
   0x1   :  { %12 = vsyncpa [#allocation6], 0 }
   0x2   :  { %13 = vsyncpa [#allocation9], 0 }
   0x3   :  { %14 = vsyncpa [#allocation4], 0  ;;  %s32_s23 = sshll.u32 %s506_s1, 4  ;;  %s432_s24 = smov [#allocation5]   ;;  %s33_s23 = int_to_ptr.hbm [resolvable:$true] %s32_s23 }
   0x4   :  { %s34_s25 = sshll.u32 %s432_s24, 4  ;;  %s19_s28 = sshll.u32 %s505_s0, 4  ;;  %s35_s25 = int_to_ptr.vmem [resolvable:$true] %s34_s25  ;;  %s20_s28 = int_to_ptr.hbm [resolvable:$true] %s19_s28 }
   0x5   :  { %s433_s29 = smov 128   ;;  %s434_s30 = smov 8  }
   0x6   :  { %40 = dma.hbm_to_vmem [thread:$0]  %s33_s23, 512, %s35_s25, [#allocation6], %s433_s29, %s433_s29, %s434_s30  }
   0x7   :  { %s435_s7 = smov [#allocation2]   ;;  %s46_s11 = sshll.u32 %s507_s2, 4  ;;  %s47_s11 = int_to_ptr.hbm [resolvable:$true] %s46_s11 }
   0x8   :  { %s21_s8 = sshll.u32 %s435_s7, 4  ;;  %s56_s13 = sshll.u32 %s508_s3, 4  ;;  %s22_s8 = int_to_ptr.vmem [resolvable:$true] %s21_s8  ;;  %s57_s13 = int_to_ptr.hbm [resolvable:$true] %s56_s13 }
   0x9   :  { %27 = dma.hbm_to_vmem [thread:$0]  %s20_s28, 512, %s22_s8, [#allocation3], %s433_s29, %s433_s29, %s434_s30  }
   0xa   :  { %s436_s14 = smov [#allocation7]   ;;  %s437_s0 = smov [#allocation8]  }
   0xb   :  { %s48_s15 = sshll.u32 %s436_s14, 4  ;;  %s58_s16 = sshll.u32 %s437_s0, 4  ;;  %s49_s15 = int_to_ptr.vmem [resolvable:$true] %s48_s15  ;;  %s59_s16 = int_to_ptr.vmem [resolvable:$true] %s58_s16 }
   0xc   :  { %51 = dma.hbm_to_vmem [thread:$0]  %s47_s11, 64, %s49_s15, [#allocation6]  }
   0xd   :  { %64 = dma.hbm_to_vmem [thread:$0]  %s57_s13, 512, %s59_s16, [#allocation9], %s433_s29, %s433_s29, %s434_s30  }
   0xe   :  { %424 = dma.done.wait [#allocation3], 512  }
   0xf   :  { %425 = vsyncadd [#allocation3], 4294966784 }
  0x10   :  { %426 = dma.done.wait [#allocation6], 576  }
  0x11   :  { %427 = vsyncadd [#allocation6], 4294966720 }
  0x12   :  { %428 = dma.done.wait [#allocation9], 512  }
  0x13   :  { %429 = vsyncadd [#allocation9], 4294966784  ;;  %v89_v0 = vld [vmem:[#allocation8 + $0x18] sm:$0xff]  ;;  %v88_v2 = vld [vmem:[#allocation8 + $0x10] sm:$0xff]  ;;  %vm94_vm0 = vcmask 261120   ;;  %v167_v41 = vlaneseq  ;;  %v438_v45 = vmov 0.0  }
  0x14   :  { %v125_v1 = vld [vmem:[#allocation5 + $0x18] sm:$0xff]  ;;  %110 = vmatpush.msra.mxu0 %v89_v0  ;;  %v124_v3 = vld [vmem:[#allocation5 + $0x10] sm:$0xff]  ;;  %v123_v5 = vld [vmem:[#allocation5 + $0x8] sm:$0xff]  ;;  %s253_s21 = sshll.u32 %s511_s6, 4  ;;  %s254_s21 = int_to_ptr.hbm [resolvable:$true] %s253_s21 }
  0x15   :  { %274 = vmatpush.msra.mxu2 %v125_v1  ;;  %275 = vmatpush.msra.mxu3 %v125_v1  ;;  %v87_v4 = vld [vmem:[#allocation8 + $0x8] sm:$0xff]  ;;  %v86_v6 = vld [vmem:[#allocation8] sm:$0xff]  ;;  %v85_v8 = vld [vmem:[#allocation7] sm:$0xf]  ;;  %v168_v42 = vand.u32 127, %v167_v41 }
  0x16   :  { %150 = vmatpush.msra.mxu1 %v125_v1  ;;  %111 = vmatpush.msra.mxu0 %v88_v2  ;;  %v122_v7 = vld [vmem:[#allocation5] sm:$0xff]  ;;  %v119_v9 = vld [vmem:[#allocation2 + $0x8] sm:$0xff]  ;;  %v120_v10 = vld [vmem:[#allocation2 + $0x10] sm:$0xff] }
  0x17   :  { %276 = vmatpush.msra.mxu2 %v124_v3  ;;  %277 = vmatpush.msra.mxu3 %v124_v3  ;;  %v118_v11 = vld [vmem:[#allocation2] sm:$0xff]  ;;  %v121_v12 = vld [vmem:[#allocation2 + $0x18] sm:$0xff]  ;;  %vm180_vm1 = vcmp.eq.s32.totalorder %v168_v42, 0  ;;  %vm192_vm2 = vcmp.eq.s32.totalorder %v168_v42, 1  ;;  %vm204_vm3 = vcmp.eq.s32.totalorder %v168_v42, 2  ;;  %vm216_vm4 = vcmp.eq.s32.totalorder %v168_v42, 3 }
  0x18   :  { %151 = vmatpush.msra.mxu1 %v124_v3  ;;  %112 = vmatpush.msra.mxu0 %v87_v4  ;;  %v290_v13 = vld [vmem:[%s509_s4] ss:$0 sm:$0xff]  ;;  %v270_v46 = vsel %vm180_vm1, 1.0, %v438_v45  ;;  %v271_v47 = vsel %vm192_vm2, 1.0, %v438_v45  ;;  %v272_v48 = vsel %vm204_vm3, 1.0, %v438_v45  ;;  %v273_v52 = vsel %vm216_vm4, 1.0, %v438_v45 }
  0x19   :  { %278 = vmatpush.msra.mxu2 %v123_v5  ;;  %279 = vmatpush.msra.mxu3 %v123_v5  ;;  %v291_v25 = vld [vmem:[%s510_s5] ss:$0 sm:$0xff]  ;;  %vm221_vm5 = vcmp.lt.s32.totalorder %v168_v42, 4  ;;  %s439_s4 = smov [#allocation10]  }
  0x1a   :  { %152 = vmatpush.msra.mxu1 %v123_v5  ;;  %113 = vmatpush.msra.mxu0 %v86_v6  ;;  %s251_s5 = sshll.u32 %s439_s4, 4  ;;  %s252_s5 = int_to_ptr.vmem [resolvable:$true] %s251_s5 }
  0x1b   :  { %280 = vmatpush.msra.mxu2 %v122_v7  ;;  %281 = vmatpush.msra.mxu3 %v122_v7 }
  0x1c   :  { %265 = vmatmul.msk.f32.vlgmr.msra.gmra.mxu0 %vm94_vm0, %v85_v8  ;;  %267 = vmatmul.msk.f32.vlgmr.msra.gmra.mxu2 %vm94_vm0, %v119_v9 }
  0x1d   :  { %268 = vmatmul.msk.f32.vlgmr.msra.gmra.mxu3 %vm94_vm0, %v120_v10  ;;  %153 = vmatpush.msra.mxu1 %v122_v7 }
  0x1e   :  { %266 = vmatmul.msk.f32.vlgmr.msra.gmra.mxu1 %vm94_vm0, %v118_v11 }
  0x25   :  { %269 = vmatmul.msk.f32.gmra.mxu3 %vm94_vm0, %v121_v12 }
  0x99   :  { %v115_v14 = vpop.f32.mrf.mxu0 }
  0x9a   :  { %v116_v15 = vadd.f32 %v290_v13, %v115_v14 }
  0x9b   :  { %v155_v16 = vpop.f32.mrf.mxu1 }
  0x9c   :  { %v169_v17 = vperm.slane %v116_v15, 0  ;;  %v185_v19 = vperm.slane %v116_v15, 1  ;;  %v197_v20 = vperm.slane %v116_v15, 2  ;;  %v209_v27 = vperm.slane %v116_v15, 3 }
  0x9e   :  { %v170_v18 = vadd.f32 %v169_v17, %v155_v16 }
  0x9f   :  { %v158_v21 = vpop.f32.mrf.mxu2 }
  0xa0   :  { %292 = vtanh.f32 %v170_v18  ;;  %v161_v22 = vpop.f32.mrf.mxu3  ;;  %v186_v23 = vadd.f32 %v185_v19, %v158_v21 }
  0xa1   :  { %v198_v24 = vadd.f32 %v197_v20, %v161_v22 }
  0xa2   :  { %294 = vtanh.f32 %v186_v23 }
  0xa3   :  { %296 = vtanh.f32 %v198_v24 }
  0xa6   :  { %v293_v26 = vpop.eup %292 }
  0xa7   :  { %v176_v28 = vmul.f32 %v293_v26, %v291_v25 }
  0xa8   :  { %v164_v29 = vpop.f32.mrf.mxu3  ;;  %v295_v30 = vpop.eup %294 }
  0xa9   :  { %v210_v31 = vadd.f32 %v209_v27, %v164_v29  ;;  %v177_v32 = vsel %vm94_vm0, %v176_v28, 0.0  ;;  %v297_v33 = vpop.eup %296  ;;  %v188_v36 = vmul.f32 %v295_v30, %v291_v25 }
  0xaa   :  { %178 = vadd.xlane.f32.xlu0 %v177_v32  ;;  %v200_v34 = vmul.f32 %v297_v33, %v291_v25 }
  0xab   :  { %298 = vtanh.f32 %v210_v31  ;;  %v189_v38 = vsel %vm94_vm0, %v188_v36, 0.0 }
  0xac   :  { %v201_v35 = vsel %vm94_vm0, %v200_v34, 0.0 }
  0xad   :  { %202 = vadd.xlane.f32.xlu1 %v201_v35 }
  0xb1   :  { %v299_v37 = vpop.eup %298 }
  0xb2   :  { %190 = vadd.xlane.f32.xlu0 %v189_v38  ;;  %v212_v39 = vmul.f32 %v299_v37, %v291_v25 }
  0xb4   :  { %v213_v40 = vsel %vm94_vm0, %v212_v39, 0.0 }
  0xb5   :  { %214 = vadd.xlane.f32.xlu1 %v213_v40 }
 0x11d   :  { %v179_v43 = vpop.xlane.xlu0 %178 }
 0x11e   :  { %v183_v50 = vmul.f32 %v270_v46, %v179_v43 }
 0x120   :  { %v203_v44 = vpop.xlane.xlu1 %202 }
 0x121   :  { %v207_v53 = vmul.f32 %v272_v48, %v203_v44 }
 0x125   :  { %v191_v49 = vpop.xlane.xlu0 %190 }
 0x126   :  { %v195_v51 = vmul.f32 %v271_v47, %v191_v49 }
 0x128   :  { %v196_v54 = vadd.f32 %v195_v51, %v183_v50  ;;  %v215_v55 = vpop.xlane.xlu1 %214 }
 0x129   :  { %v219_v56 = vmul.f32 %v273_v52, %v215_v55 }
 0x12a   :  { %v208_v57 = vadd.f32 %v207_v53, %v196_v54 }
 0x12c   :  { %v220_v58 = vadd.f32 %v219_v56, %v208_v57 }
 0x12e   :  { %v222_v59 = vsel %vm221_vm5, %v220_v58, -1e+30 }
 0x12f   :  { %223 = vmax.xlane.f32.xlu2 %v222_v59 }
 0x1a2   :  { %v224_v60 = vpop.xlane.xlu2 %223 }
 0x1a3   :  { %v225_v61 = vsub.f32 %v222_v59, %v224_v60 }
 0x1a5   :  { %v226_v62 = vmul.f32 1.442695, %v225_v61 }
 0x1a7   :  { %300 = vpow2.f32 %v226_v62 }
 0x1ad   :  { %v301_v63 = vpop.eup %300 }
 0x1ae   :  { %228 = vadd.xlane.f32.xlu2 %v301_v63 }
 0x221   :  { %v229_v0 = vpop.xlane.xlu2 %228 }
 0x222   :  { %302 = vrcp.f32 %v229_v0  ;;  %v241_v4 = vand.u32 2147483648, %v229_v0  ;;  %v239_v6 = vand.u32 2147483647, %v229_v0  ;;  %vm235_vm7 = vweird.f32 %v229_v0 }
 0x224   :  { %v242_v8 = vor.u32 1.1754944e-38, %v241_v4  ;;  %vm240_vm9 = vcmp.eq.f32.partialorder %v239_v6, 8.507059e+37 }
 0x228   :  { %v303_v1 = vpop.eup %302 }
 0x229   :  { %v231_v2 = vmul.f32 %v303_v1, %v229_v0  ;;  %vm236_vm6 = vweird.f32 %v303_v1 }
 0x22a   :  { %vm237_vm8 = vmor %vm235_vm7, %vm236_vm6 }
 0x22b   :  { %v232_v3 = vsub.f32 1.0, %v231_v2 }
 0x22d   :  { %v233_v5 = vmul.f32 %v303_v1, %v232_v3 }
 0x22f   :  { %v234_v7 = vadd.f32 %v303_v1, %v233_v5 }
 0x231   :  { %v238_v9 = vsel %vm237_vm8, %v303_v1, %v234_v7 }
 0x232   :  { %v243_v10 = vsel %vm240_vm9, %v242_v8, %v238_v9 }
 0x233   :  { %v244_v11 = vmul.f32 %v301_v63, %v243_v10 }
 0x235   :  { %245 = vst [vmem:[#allocation10] sm:$0xff] %v244_v11 }
 0x236   :  { %256 = dma.vmem_to_hbm [thread:$0]  %s252_s5, 128, %s254_s21, [#allocation4]  }
 0x237   :  { %430 = dma.done.wait [#allocation4], 128  }
 0x238   :  { %431 = vsyncadd [#allocation4], 4294967168 }
 0x239   :  { %261 = vsyncpa [#allocation3], 1 }
 0x23a   :  { %262 = vsyncpa [#allocation6], 1 }
 0x23b   :  { %263 = vsyncpa [#allocation9], 1 }
 0x23c   :  { %264 = vsyncpa [#allocation4], 1 }

</bundles_post_ra>
